<compile_context>
chip_gen: v7x
topology: tpu7x:2x2x1
jax: 0.10.0
libtpu: 0.0.40
codegen_flags: <defaults>
</compile_context>

<pallas_src>
import jax
import jax.numpy as jnp
from jax import lax
from jax.experimental import pallas as pl
from jax.experimental.pallas import tpu as pltpu

HIDDEN_DIM = 128
BN_EPS = 1e-5


def _round_up(n, m):
    return ((n + m - 1) // m) * m


def _batch_norm(h, gamma, beta):
    """Training-mode BN in scale/shift form. h: [B,F] f32, gamma/beta: [1,F] f32."""
    mean = jnp.mean(h, axis=0, keepdims=True)
    # Single-pass variance, clamped to avoid NaN from catastrophic cancellation.
    var = jnp.maximum(jnp.mean(h * h, axis=0, keepdims=True) - mean * mean, 0.0)
    scale = gamma * lax.rsqrt(var + BN_EPS)          # [1,F]
    shift = beta - scale * mean                      # [1,F]
    return h * scale + shift                         # 2 full-size VPU ops


def _make_kernel(n_inputs, n_in_pad):
    """Build the kernel with static slice offsets into the packed weight buffer."""
    w1a_lo = n_in_pad
    w2_lo = n_in_pad + HIDDEN_DIM

    def rl_model_kernel(x_ref, w_ref, bn_ref, o_ref):
        bn = bn_ref[...]                             # [6,128] f32 packed BN params
        x = x_ref[...]
        if x.dtype != jnp.bfloat16:                  # trace-time check; cast only if needed
            x = x.astype(jnp.bfloat16)

        # fc1 -> bn1 -> relu   (Linear bias cancelled by BN mean subtraction)
        h = jnp.dot(x, w_ref[0:n_inputs, :], preferred_element_type=jnp.float32)
        h = _batch_norm(h, bn[0:1, :], bn[1:2, :])
        h = jnp.maximum(h, 0.0)

        # fc1a -> bn1a -> relu
        h = jnp.dot(h.astype(jnp.bfloat16), w_ref[w1a_lo:w1a_lo + HIDDEN_DIM, :],
                    preferred_element_type=jnp.float32)
        h = _batch_norm(h, bn[2:3, :], bn[3:4, :])
        h = jnp.maximum(h, 0.0)

        # fc2 (lane-padded to 128) -> bn2
        h = jnp.dot(h.astype(jnp.bfloat16), w_ref[w2_lo:w2_lo + HIDDEN_DIM, :],
                    preferred_element_type=jnp.float32)
        h = _batch_norm(h, bn[4:5, :], bn[5:6, :])

        o_ref[...] = h.astype(o_ref.dtype)           # full-lane unmasked store

    return rl_model_kernel


def rl_model_forward_padded(x, params):
    """x: [B, n_inputs] (f32 or bf16). Returns the lane-padded [B, 128] slab."""
    B, n_inputs = x.shape
    n_in_pad = _round_up(n_inputs, 16)
    vmem = pl.BlockSpec(memory_space=pltpu.MemorySpace.VMEM)
    return pl.pallas_call(
        _make_kernel(n_inputs, n_in_pad),
        out_shape=jax.ShapeDtypeStruct((B, HIDDEN_DIM), jnp.float32),
        in_specs=[vmem, vmem, vmem],
        out_specs=vmem,
    )(x, params["weights"], params["bn"])


def rl_model_forward(x, params, n_outputs):
    """PyTorch-shaped API: [B, n_outputs]. Prefer rl_model_forward_padded if the
    consumer can read the padded slab directly (avoids a post-kernel slice op)."""
    return rl_model_forward_padded(x, params)[:, :n_outputs]


def init_params(key, n_inputs, n_outputs):
    """Synthetic parameters matching RLModel's shapes.

    All three Linear weights are stored [in, out] (transpose of PyTorch
    [out, in]), row-packed into a single bf16 buffer
    [n_in_pad + 2*HIDDEN_DIM, HIDDEN_DIM] (rows: w1 padded to n_in_pad, w1a,
    w2 lane-padded to 128 outputs).  Linear biases are intentionally omitted:
    each Linear is followed by *training-mode* BatchNorm whose mean
    subtraction cancels a per-feature bias exactly (NOT valid for
    inference-mode BN with running statistics).  BN gamma/beta are packed
    into one [6,128] f32 buffer (rows: g1, b1, g1a, b1a, g2_pad, b2_pad);
    padded fc2 lanes use gamma=1, beta=0 so they stay exactly 0.
    """
    ks = jax.random.split(key, 9)
    scale = 0.1
    n_in_pad = _round_up(n_inputs, 16)

    w1 = scale * jax.random.normal(ks[0], (n_inputs, HIDDEN_DIM), jnp.float32)
    w1p = jnp.zeros((n_in_pad, HIDDEN_DIM), jnp.float32).at[:n_inputs].set(w1)
    w1a = scale * jax.random.normal(ks[1], (HIDDEN_DIM, HIDDEN_DIM), jnp.float32)
    w2 = scale * jax.random.normal(ks[2], (HIDDEN_DIM, n_outputs), jnp.float32)
    w2p = jnp.zeros((HIDDEN_DIM, HIDDEN_DIM), jnp.float32).at[:, :n_outputs].set(w2)

    weights = jnp.concatenate([w1p, w1a, w2p], axis=0).astype(jnp.bfloat16)

    g1 = 1.0 + 0.1 * jax.random.normal(ks[3], (HIDDEN_DIM,), jnp.float32)
    b1 = 0.1 * jax.random.normal(ks[4], (HIDDEN_DIM,), jnp.float32)
    g1a = 1.0 + 0.1 * jax.random.normal(ks[5], (HIDDEN_DIM,), jnp.float32)
    b1a = 0.1 * jax.random.normal(ks[6], (HIDDEN_DIM,), jnp.float32)
    g2 = (jnp.ones((HIDDEN_DIM,), jnp.float32)
          .at[:n_outputs].set(1.0 + 0.1 * jax.random.normal(ks[7], (n_outputs,), jnp.float32)))
    b2 = (jnp.zeros((HIDDEN_DIM,), jnp.float32)
          .at[:n_outputs].set(0.1 * jax.random.normal(ks[8], (n_outputs,), jnp.float32)))

    bn = jnp.stack([g1, b1, g1a, b1a, g2, b2], axis=0)  # [6, 128] f32
    return {"weights": weights, "bn": bn}


def rl_model_ref(x, p, n_inputs, n_outputs):
    """Pure-JAX reference with the same precision policy (bf16 MXU operands,
    f32 accumulation, f32 two-pass BatchNorm)."""
    def bn(h, g, b):
        m = jnp.mean(h, axis=0, keepdims=True)
        v = jnp.mean((h - m) ** 2, axis=0, keepdims=True)
        return g * (h - m) / jnp.sqrt(v + BN_EPS) + b

    n_in_pad = _round_up(n_inputs, 16)
    W = p["weights"]
    w1 = W[0:n_inputs]
    w1a = W[n_in_pad:n_in_pad + HIDDEN_DIM]
    w2 = W[n_in_pad + HIDDEN_DIM:n_in_pad + 2 * HIDDEN_DIM]
    pb = p["bn"]

    h = jnp.dot(x.astype(jnp.bfloat16), w1, preferred_element_type=jnp.float32)
    h = jnp.maximum(bn(h, pb[0:1], pb[1:2]), 0.0)
    h = jnp.dot(h.astype(jnp.bfloat16), w1a, preferred_element_type=jnp.float32)
    h = jnp.maximum(bn(h, pb[2:3], pb[3:4]), 0.0)
    h = jnp.dot(h.astype(jnp.bfloat16), w2, preferred_element_type=jnp.float32)
    h = bn(h, pb[4:5], pb[5:6])
    return h[:, :n_outputs]


if __name__ == "__main__":
    key = jax.random.PRNGKey(0)
    k_x, k_p = jax.random.split(key)

    batch = 8
    n_inputs = 32
    n_outputs = 8

    x = jax.random.normal(k_x, (batch, n_inputs), jnp.float32)
    params = init_params(k_p, n_inputs, n_outputs)

    out_padded = jax.block_until_ready(rl_model_forward_padded(x, params))
    out = out_padded[:, :n_outputs]          # lazy slice on the consumer side
    ref = rl_model_ref(x, params, n_inputs, n_outputs)

    assert out_padded.shape == (batch, HIDDEN_DIM)
    assert out.shape == (batch, n_outputs)
    assert jnp.allclose(out, ref, atol=1e-3, rtol=1e-3), "mismatch vs JAX reference"
    # Padded lanes must be exactly zero (gamma_pad=1, beta_pad=0 convention).
    assert jnp.all(out_padded[:, n_outputs:] == 0.0)

    print("KERNEL_OK")
</pallas_src>

<mosaic_0001>
module attributes {stable_mosaic.version = 11 : i64} {
  func.func @rl_model_kernel(%arg0: memref<8x32xf32, #tpu.memory_space<vmem>>, %arg1: memref<288x128xbf16, #tpu.memory_space<vmem>>, %arg2: memref<6x128xf32, #tpu.memory_space<vmem>>, %arg3: memref<8x128xf32, #tpu.memory_space<vmem>>) attributes {dimension_semantics = [], scalar_prefetch = 0 : i64, scratch_operands = 0 : i64, tpu.core_type = #tpu.core_type<tc>} {
    %c0 = arith.constant 0 : index
    %c0_0 = arith.constant 0 : index
    %0 = vector.load %arg2[%c0, %c0_0] : memref<6x128xf32, #tpu.memory_space<vmem>>, vector<6x128xf32>
    %c0_1 = arith.constant 0 : index
    %c0_2 = arith.constant 0 : index
    %1 = vector.load %arg0[%c0_1, %c0_2] : memref<8x32xf32, #tpu.memory_space<vmem>>, vector<8x32xf32>
    %2 = arith.truncf %1 : vector<8x32xf32> to vector<8x32xbf16>
    %c0_3 = arith.constant 0 : index
    %c0_4 = arith.constant 0 : index
    %3 = vector.load %arg1[%c0_3, %c0_4] : memref<288x128xbf16, #tpu.memory_space<vmem>>, vector<32x128xbf16>
    %cst = arith.constant dense<0.000000e+00> : vector<8x128xf32>
    %4 = tpu.matmul %2, %3, %cst {dimension_numbers = #tpu.dot_dimension_numbers<[1], [0], [0], [1], [0, 0, 1, 1], [], []>} : vector<8x32xbf16>, vector<32x128xbf16>, vector<8x128xf32> -> vector<8x128xf32>
    %5 = vector.extract_strided_slice %0 {offsets = [0, 0], sizes = [1, 128], strides = [1, 1]} : vector<6x128xf32> to vector<1x128xf32>
    %6 = vector.extract_strided_slice %0 {offsets = [1, 0], sizes = [1, 128], strides = [1, 1]} : vector<6x128xf32> to vector<1x128xf32>
    %cst_5 = arith.constant dense<0.000000e+00> : vector<128xf32>
    %7 = vector.multi_reduction <add>, %4, %cst_5 [0] : vector<8x128xf32> to vector<128xf32>
    %8 = vector.shape_cast %7 : vector<128xf32> to vector<1x128xf32>
    %cst_6 = arith.constant 8.000000e+00 : f32
    %9 = vector.broadcast %cst_6 : f32 to vector<1x128xf32>
    %10 = arith.divf %8, %9 : vector<1x128xf32>
    %11 = arith.mulf %4, %4 : vector<8x128xf32>
    %cst_7 = arith.constant dense<0.000000e+00> : vector<128xf32>
    %12 = vector.multi_reduction <add>, %11, %cst_7 [0] : vector<8x128xf32> to vector<128xf32>
    %13 = vector.shape_cast %12 : vector<128xf32> to vector<1x128xf32>
    %cst_8 = arith.constant 8.000000e+00 : f32
    %14 = vector.broadcast %cst_8 : f32 to vector<1x128xf32>
    %15 = arith.divf %13, %14 : vector<1x128xf32>
    %16 = arith.mulf %10, %10 : vector<1x128xf32>
    %17 = arith.subf %15, %16 : vector<1x128xf32>
    %cst_9 = arith.constant 0.000000e+00 : f32
    %18 = vector.broadcast %cst_9 : f32 to vector<1x128xf32>
    %19 = arith.maximumf %17, %18 : vector<1x128xf32>
    %cst_10 = arith.constant 9.99999974E-6 : f32
    %20 = vector.broadcast %cst_10 : f32 to vector<1x128xf32>
    %21 = arith.addf %19, %20 : vector<1x128xf32>
    %22 = math.rsqrt %21 : vector<1x128xf32>
    %23 = arith.mulf %5, %22 : vector<1x128xf32>
    %24 = arith.mulf %23, %10 : vector<1x128xf32>
    %25 = arith.subf %6, %24 : vector<1x128xf32>
    %26 = vector.broadcast %23 : vector<1x128xf32> to vector<8x128xf32>
    %27 = arith.mulf %4, %26 : vector<8x128xf32>
    %28 = vector.broadcast %25 : vector<1x128xf32> to vector<8x128xf32>
    %29 = arith.addf %27, %28 : vector<8x128xf32>
    %cst_11 = arith.constant 0.000000e+00 : f32
    %30 = vector.broadcast %cst_11 : f32 to vector<8x128xf32>
    %31 = arith.maximumf %29, %30 : vector<8x128xf32>
    %32 = arith.truncf %31 : vector<8x128xf32> to vector<8x128xbf16>
    %c32 = arith.constant 32 : index
    %c0_12 = arith.constant 0 : index
    %33 = vector.load %arg1[%c32, %c0_12] : memref<288x128xbf16, #tpu.memory_space<vmem>>, vector<128x128xbf16>
    %cst_13 = arith.constant dense<0.000000e+00> : vector<8x128xf32>
    %34 = tpu.matmul %32, %33, %cst_13 {dimension_numbers = #tpu.dot_dimension_numbers<[1], [0], [0], [1], [0, 0, 1, 1], [], []>} : vector<8x128xbf16>, vector<128x128xbf16>, vector<8x128xf32> -> vector<8x128xf32>
    %35 = vector.extract_strided_slice %0 {offsets = [2, 0], sizes = [1, 128], strides = [1, 1]} : vector<6x128xf32> to vector<1x128xf32>
    %36 = vector.extract_strided_slice %0 {offsets = [3, 0], sizes = [1, 128], strides = [1, 1]} : vector<6x128xf32> to vector<1x128xf32>
    %cst_14 = arith.constant dense<0.000000e+00> : vector<128xf32>
    %37 = vector.multi_reduction <add>, %34, %cst_14 [0] : vector<8x128xf32> to vector<128xf32>
    %38 = vector.shape_cast %37 : vector<128xf32> to vector<1x128xf32>
    %cst_15 = arith.constant 8.000000e+00 : f32
    %39 = vector.broadcast %cst_15 : f32 to vector<1x128xf32>
    %40 = arith.divf %38, %39 : vector<1x128xf32>
    %41 = arith.mulf %34, %34 : vector<8x128xf32>
    %cst_16 = arith.constant dense<0.000000e+00> : vector<128xf32>
    %42 = vector.multi_reduction <add>, %41, %cst_16 [0] : vector<8x128xf32> to vector<128xf32>
    %43 = vector.shape_cast %42 : vector<128xf32> to vector<1x128xf32>
    %cst_17 = arith.constant 8.000000e+00 : f32
    %44 = vector.broadcast %cst_17 : f32 to vector<1x128xf32>
    %45 = arith.divf %43, %44 : vector<1x128xf32>
    %46 = arith.mulf %40, %40 : vector<1x128xf32>
    %47 = arith.subf %45, %46 : vector<1x128xf32>
    %cst_18 = arith.constant 0.000000e+00 : f32
    %48 = vector.broadcast %cst_18 : f32 to vector<1x128xf32>
    %49 = arith.maximumf %47, %48 : vector<1x128xf32>
    %cst_19 = arith.constant 9.99999974E-6 : f32
    %50 = vector.broadcast %cst_19 : f32 to vector<1x128xf32>
    %51 = arith.addf %49, %50 : vector<1x128xf32>
    %52 = math.rsqrt %51 : vector<1x128xf32>
    %53 = arith.mulf %35, %52 : vector<1x128xf32>
    %54 = arith.mulf %53, %40 : vector<1x128xf32>
    %55 = arith.subf %36, %54 : vector<1x128xf32>
    %56 = vector.broadcast %53 : vector<1x128xf32> to vector<8x128xf32>
    %57 = arith.mulf %34, %56 : vector<8x128xf32>
    %58 = vector.broadcast %55 : vector<1x128xf32> to vector<8x128xf32>
    %59 = arith.addf %57, %58 : vector<8x128xf32>
    %cst_20 = arith.constant 0.000000e+00 : f32
    %60 = vector.broadcast %cst_20 : f32 to vector<8x128xf32>
    %61 = arith.maximumf %59, %60 : vector<8x128xf32>
    %62 = arith.truncf %61 : vector<8x128xf32> to vector<8x128xbf16>
    %c160 = arith.constant 160 : index
    %c0_21 = arith.constant 0 : index
    %63 = vector.load %arg1[%c160, %c0_21] : memref<288x128xbf16, #tpu.memory_space<vmem>>, vector<128x128xbf16>
    %cst_22 = arith.constant dense<0.000000e+00> : vector<8x128xf32>
    %64 = tpu.matmul %62, %63, %cst_22 {dimension_numbers = #tpu.dot_dimension_numbers<[1], [0], [0], [1], [0, 0, 1, 1], [], []>} : vector<8x128xbf16>, vector<128x128xbf16>, vector<8x128xf32> -> vector<8x128xf32>
    %65 = vector.extract_strided_slice %0 {offsets = [4, 0], sizes = [1, 128], strides = [1, 1]} : vector<6x128xf32> to vector<1x128xf32>
    %66 = vector.extract_strided_slice %0 {offsets = [5, 0], sizes = [1, 128], strides = [1, 1]} : vector<6x128xf32> to vector<1x128xf32>
    %cst_23 = arith.constant dense<0.000000e+00> : vector<128xf32>
    %67 = vector.multi_reduction <add>, %64, %cst_23 [0] : vector<8x128xf32> to vector<128xf32>
    %68 = vector.shape_cast %67 : vector<128xf32> to vector<1x128xf32>
    %cst_24 = arith.constant 8.000000e+00 : f32
    %69 = vector.broadcast %cst_24 : f32 to vector<1x128xf32>
    %70 = arith.divf %68, %69 : vector<1x128xf32>
    %71 = arith.mulf %64, %64 : vector<8x128xf32>
    %cst_25 = arith.constant dense<0.000000e+00> : vector<128xf32>
    %72 = vector.multi_reduction <add>, %71, %cst_25 [0] : vector<8x128xf32> to vector<128xf32>
    %73 = vector.shape_cast %72 : vector<128xf32> to vector<1x128xf32>
    %cst_26 = arith.constant 8.000000e+00 : f32
    %74 = vector.broadcast %cst_26 : f32 to vector<1x128xf32>
    %75 = arith.divf %73, %74 : vector<1x128xf32>
    %76 = arith.mulf %70, %70 : vector<1x128xf32>
    %77 = arith.subf %75, %76 : vector<1x128xf32>
    %cst_27 = arith.constant 0.000000e+00 : f32
    %78 = vector.broadcast %cst_27 : f32 to vector<1x128xf32>
    %79 = arith.maximumf %77, %78 : vector<1x128xf32>
    %cst_28 = arith.constant 9.99999974E-6 : f32
    %80 = vector.broadcast %cst_28 : f32 to vector<1x128xf32>
    %81 = arith.addf %79, %80 : vector<1x128xf32>
    %82 = math.rsqrt %81 : vector<1x128xf32>
    %83 = arith.mulf %65, %82 : vector<1x128xf32>
    %84 = arith.mulf %83, %70 : vector<1x128xf32>
    %85 = arith.subf %66, %84 : vector<1x128xf32>
    %86 = vector.broadcast %83 : vector<1x128xf32> to vector<8x128xf32>
    %87 = arith.mulf %64, %86 : vector<8x128xf32>
    %88 = vector.broadcast %85 : vector<1x128xf32> to vector<8x128xf32>
    %89 = arith.addf %87, %88 : vector<8x128xf32>
    %c0_29 = arith.constant 0 : index
    %c0_30 = arith.constant 0 : index
    %90 = vector.load %arg3[%c0_29, %c0_30] : memref<8x128xf32, #tpu.memory_space<vmem>>, vector<8x128xf32>
    tpu.vector_store %arg3[%c0_29, %c0_30], %89 {strides = array<i32>} : memref<8x128xf32, #tpu.memory_space<vmem>>, vector<8x128xf32>,
    return
  }
}

</mosaic_0001>

<bundles_post_ra>
// kernel: tpu_custom_call.1
= control target key start
LH: loop header
LB: loop body
LE: loop exit
PB: predicated region body
PF: predicated region fallthrough
CT: control target
= control target key end

     0   :  { %8 = vsyncpa [#allocation3], 0  ;;  %s781_s0 = inlined_call_operand.hbm [shape: f32[8,32], index: 0, kind: input, shape index: {}]   ;;  %s782_s1 = inlined_call_operand.hbm [shape: bf16[288,128], index: 1, kind: input, shape index: {}]   ;;  %s783_s2 = inlined_call_operand.hbm [shape: f32[6,128], index: 2, kind: input, shape index: {}]   ;;  %s784_s3 = inlined_call_operand.hbm [shape: f32[8,128], index: 3, kind: output, shape index: {}]  }
   0x1   :  { %9 = vsyncpa [#allocation6], 0 }
   0x2   :  { %10 = vsyncpa [#allocation4], 0  ;;  %s668_s12 = smov [#allocation5]   ;;  %s574_s16 = scalar_lea.hbm %s782_s1, 2304 }
   0x3   :  { %s26_s13 = sshll.u32 %s668_s12, 4  ;;  %p575_p0 = scmp.ne.s32.totalorder %s782_s1, %s574_s16  ;;  %s27_s13 = int_to_ptr.vmem [resolvable:$true] %s26_s13 }
   0x4   :  { %p578_p1 = scmp.lt.u32.totalorder %s574_s16, %s782_s1 }
   0x6   :  { %p580_p2 = pnand %p578_p1, %p575_p0 }
   0x8   :  { %583 = shalt.err (!%p580_p2)
}
   0x9   :  { %s584_s21 = scalar_lea.vmem %s27_s13, 2304  ;;  %p589_p4 = scmp.lt.s32.totalorder %s27_s13, %s27_s13 }
   0xa   :  { %p585_p3 = scmp.ne.s32.totalorder %s27_s13, %s584_s21  ;;  %p590_p5 = scmp.lt.s32.totalorder %s584_s21, %s584_s21 }
   0xc   :  { %p591_p6 = por %p590_p5, %p589_p4 }
   0xe   :  { %p592_p7 = pnand %p591_p6, %p585_p3 }
  0x10   :  { %595 = shalt.err (!%p592_p7)
}
  0x11   :  { %s669_s22 = smov 64   ;;  %s670_s23 = smov 4  }
  0x12   :  { %32 = dma.hbm_to_vmem [thread:$0]  %s782_s1, 2304, %s27_s13, [#allocation6], %s669_s22, %s669_s22, %s670_s23  }
  0x13   :  { %s671_s26 = smov [#allocation2]   ;;  %s672_s28 = smov [#allocation7]  }
  0x14   :  { %s17_s27 = sshll.u32 %s671_s26, 4  ;;  %s39_s29 = sshll.u32 %s672_s28, 4  ;;  %s18_s27 = int_to_ptr.vmem [resolvable:$true] %s17_s27  ;;  %s40_s29 = int_to_ptr.vmem [resolvable:$true] %s39_s29 }
  0x15   :  { %s596_s5 = scalar_lea.hbm %s781_s0, 128 }
  0x16   :  { %p597_p8 = scmp.ne.s32.totalorder %s781_s0, %s596_s5  ;;  %p600_p9 = scmp.lt.u32.totalorder %s596_s5, %s781_s0 }
  0x18   :  { %p602_p10 = pnand %p600_p9, %p597_p8 }
  0x1a   :  { %605 = shalt.err (!%p602_p10)
}
  0x1b   :  { %s606_s1 = scalar_lea.vmem %s18_s27, 128  ;;  %p611_p12 = scmp.lt.s32.totalorder %s18_s27, %s18_s27 }
  0x1c   :  { %p607_p11 = scmp.ne.s32.totalorder %s18_s27, %s606_s1  ;;  %p612_p13 = scmp.lt.s32.totalorder %s606_s1, %s606_s1 }
  0x1e   :  { %p613_p0 = por %p612_p13, %p611_p12 }
  0x20   :  { %p614_p1 = pnand %p613_p0, %p607_p11 }
  0x22   :  { %617 = shalt.err (!%p614_p1)
}
  0x23   :  { %20 = dma.hbm_to_vmem [thread:$0]  %s781_s0, 128, %s18_s27, [#allocation3]  }
  0x24   :  { %s618_s14 = scalar_lea.hbm %s783_s2, 128 }
  0x25   :  { %p619_p2 = scmp.ne.s32.totalorder %s783_s2, %s618_s14  ;;  %p622_p3 = scmp.lt.u32.totalorder %s618_s14, %s783_s2 }
  0x27   :  { %p624_p4 = pnand %p622_p3, %p619_p2 }
  0x29   :  { %627 = shalt.err (!%p624_p4)
}
  0x2a   :  { %s628_s19 = scalar_lea.vmem %s40_s29, 128  ;;  %p633_p6 = scmp.lt.s32.totalorder %s40_s29, %s40_s29 }
  0x2b   :  { %p629_p5 = scmp.ne.s32.totalorder %s40_s29, %s628_s19  ;;  %p634_p7 = scmp.lt.s32.totalorder %s628_s19, %s628_s19 }
  0x2d   :  { %p635_p8 = por %p634_p7, %p633_p6 }
  0x2f   :  { %p636_p9 = pnand %p635_p8, %p629_p5 }
  0x31   :  { %639 = shalt.err (!%p636_p9)
}
  0x32   :  { %42 = dma.hbm_to_vmem [thread:$0]  %s783_s2, 128, %s40_s29, [#allocation6]  }
  0x33   :  { %662 = dma.done.wait [#allocation3], 128  }
  0x34   :  { %663 = vsyncadd [#allocation3], 4294967168 }
  0x35   :  { %664 = dma.done.wait [#allocation6], 2432  }
  0x36   :  { %665 = vsyncadd [#allocation6], 4294964864  ;;  %v673_v0 = vmov 0.0   ;;  %vm674_vm0 = vmmov 0   ;;  %v550_v1 = vld [vmem:[#allocation5] sm:$0xff]   ;;  %v551_v2 = vld [vmem:[#allocation5 + $0x8] sm:$0xff]   ;;  %v143_v36 = vlaneseq }
  0x37   :  { %494 = vmatprep.subr.bf16.mxu0 %v673_v0  ;;  %498 = vmatprep.mubr.msk.bf16.mxu0 %vm674_vm0, %v673_v0  ;;  %v54_v3 = vld [vmem:[#allocation2] sm:$0xff]  ;;  %vm72_vm1 = vcmask 261120   ;;  %v552_v5 = vld [vmem:[#allocation5 + $0x10] sm:$0xff]   ;;  %v554_v7 = vld [vmem:[#allocation5 + $0x20] sm:$0xff]   ;;  %s675_s2 = smov [#allocation8]  }
  0x38   :  { %502 = vmatprep.subr.bf16.mxu1 %v673_v0  ;;  %518 = vmatprep.mubr.msk.bf16.mxu1 %vm674_vm0, %v673_v0  ;;  %v55_v4 = vpack.c.bf16 %v54_v3, %v54_v3  ;;  %v553_v6 = vld [vmem:[#allocation5 + $0x18] sm:$0xff]   ;;  %v555_v8 = vld [vmem:[#allocation5 + $0x28] sm:$0xff]   ;;  %v556_v9 = vld [vmem:[#allocation5 + $0x30] sm:$0xff]   ;;  %v746_v37 = vshrl.u32 %v143_v36, 7  ;;  %s444_s21 = sshll.u32 %s675_s2, 4  ;;  %s445_s21 = int_to_ptr.vmem [resolvable:$true] %s444_s21 }
  0x39   :  { %495 = vmatpush3.bf16.msra.mxu0 %v550_v1  ;;  %503 = vmatpush3.bf16.msra.mxu1 %v552_v5  ;;  %v557_v10 = vld [vmem:[#allocation5 + $0x38] sm:$0xff]   ;;  %v558_v11 = vld [vmem:[#allocation5 + $0x40] sm:$0xff]   ;;  %v559_v12 = vld [vmem:[#allocation5 + $0x48] sm:$0xff]   ;;  %s640_s22 = scalar_lea.vmem %s445_s21, 128  ;;  %p645_p11 = scmp.lt.s32.totalorder %s445_s21, %s445_s21 }
  0x3a   :  { %496 = vmatprep.subr.bf16.mxu0 %v673_v0  ;;  %504 = vmatprep.subr.bf16.mxu1 %v673_v0  ;;  %v748_v38 = vld [vmem:[#allocation7] sm:$0x3f]  ;;  %v145_v41 = vsub.s32 0, %v746_v37  ;;  %v150_v45 = vsub.s32 1, %v746_v37  ;;  %v561_v53 = vld [vmem:[#allocation5 + $0x58] sm:$0xff]   ;;  %v562_v54 = vld [vmem:[#allocation5 + $0x60] sm:$0xff]   ;;  %p641_p10 = scmp.ne.s32.totalorder %s445_s21, %s640_s22  ;;  %p646_p12 = scmp.lt.s32.totalorder %s640_s22, %s640_s22 }
  0x3b   :  { %v560_v52 = vld [vmem:[#allocation5 + $0x50] sm:$0xff]   ;;  %v563_v55 = vld [vmem:[#allocation5 + $0x68] sm:$0xff]   ;;  %v565_v57 = vld [vmem:[#allocation5 + $0x78] sm:$0xff]  }
  0x3c   :  { %v564_v56 = vld [vmem:[#allocation5 + $0x70] sm:$0xff]   ;;  %v566_v58 = vld [vmem:[#allocation5 + $0x80] sm:$0xff]   ;;  %v567_v59 = vld [vmem:[#allocation5 + $0x88] sm:$0xff]   ;;  %p647_p13 = por %p646_p12, %p645_p11 }
  0x3d   :  { %497 = vmatpush3.bf16.msra.mxu0 %v551_v2  ;;  %505 = vmatpush3.bf16.msra.mxu1 %v553_v6 }
  0x3e   :  { %522 = vmatprep.subr.bf16.mxu0 %v673_v0  ;;  %506 = vmatprep.subr.bf16.mxu1 %v673_v0  ;;  %p648_p0 = pnand %p647_p13, %p641_p10 }
  0x40   :  { %499 = vmatmul.mubr.msk.bf16.vlgmr.msra.gmra.mrb[0].mxu0 %vm72_vm1, %v55_v4 }
  0x41   :  { %538 = vmatprep.mubr.msk.bf16.mxu0 %vm674_vm0, %v673_v0  ;;  %507 = vmatpush3.bf16.msra.mxu1 %v554_v7 }
  0x42   :  { %508 = vmatprep.subr.bf16.mxu1 %v673_v0  ;;  %523 = vmatpush3.bf16.msra.mxu0 %v560_v52 }
  0x43   :  { %524 = vmatprep.subr.bf16.mxu0 %v673_v0 }
  0x45   :  { %509 = vmatpush3.bf16.msra.mxu1 %v555_v8 }
  0x46   :  { %510 = vmatprep.subr.bf16.mxu1 %v673_v0  ;;  %525 = vmatpush3.bf16.msra.mxu0 %v561_v53 }
  0x47   :  { %526 = vmatprep.subr.bf16.mxu0 %v673_v0 }
  0x49   :  { %511 = vmatpush3.bf16.msra.mxu1 %v556_v9 }
  0x4a   :  { %512 = vmatprep.subr.bf16.mxu1 %v673_v0  ;;  %527 = vmatpush3.bf16.msra.mxu0 %v562_v54 }
  0x4b   :  { %528 = vmatprep.subr.bf16.mxu0 %v673_v0 }
  0x4d   :  { %513 = vmatpush3.bf16.msra.mxu1 %v557_v10 }
  0x4e   :  { %514 = vmatprep.subr.bf16.mxu1 %v673_v0  ;;  %529 = vmatpush3.bf16.msra.mxu0 %v563_v55 }
  0x4f   :  { %530 = vmatprep.subr.bf16.mxu0 %v673_v0 }
  0x51   :  { %515 = vmatpush3.bf16.msra.mxu1 %v558_v11 }
  0x52   :  { %516 = vmatprep.subr.bf16.mxu1 %v673_v0  ;;  %531 = vmatpush3.bf16.msra.mxu0 %v564_v56 }
  0x53   :  { %532 = vmatprep.subr.bf16.mxu0 %v673_v0 }
  0x55   :  { %517 = vmatpush3.bf16.msra.mxu1 %v559_v12 }
  0x56   :  { %533 = vmatpush3.bf16.msra.mxu0 %v565_v57 }
  0x57   :  { %534 = vmatprep.subr.bf16.mxu0 %v673_v0 }
  0x5a   :  { %535 = vmatpush3.bf16.msra.mxu0 %v566_v58 }
  0x5b   :  { %536 = vmatprep.subr.bf16.mxu0 %v673_v0 }
  0x5e   :  { %537 = vmatpush3.bf16.msra.mxu0 %v567_v59  ;;  %v429_v59 = vsub.s32 4, %v746_v37 }
 0x113   :  { %v110_v13 = vpop.f32.mrb[0].mxu0 }
 0x114   :  { %v116_v14 = vrot.slane %v110_v13, 4  ;;  %v124_v15 = vmul.f32 %v110_v13, %v110_v13  ;;  %v500_v16 = vpop.f32.mrb[1].mxu0 }
 0x115   :  { %v113_v17 = vpop.f32.mrb[2].mxu0 }
 0x116   :  { %v117_v18 = vadd.f32 %v116_v14, %v110_v13  ;;  %v125_v19 = vrot.slane %v124_v15, 4  ;;  %v501_v20 = vpop.f32.mrb[3].mxu0 }
 0x118   :  { %v118_v21 = vrot.slane %v117_v18, 2  ;;  %v126_v22 = vadd.f32 %v125_v19, %v124_v15 }
 0x11a   :  { %v119_v23 = vadd.f32 %v118_v21, %v117_v18  ;;  %v127_v24 = vrot.slane %v126_v22, 2  ;;  %v287_v21 = vsub.s32 2, %v746_v37 }
 0x11c   :  { %v120_v25 = vrot.slane %v119_v23, 1  ;;  %v128_v26 = vadd.f32 %v127_v24, %v126_v22 }
 0x11e   :  { %v121_v27 = vadd.f32 %v120_v25, %v119_v23  ;;  %v129_v28 = vrot.slane %v128_v26, 1  ;;  %v292_v25 = vsub.s32 3, %v746_v37 }
 0x120   :  { %v123_v29 = vmul.f32 0.125, %v121_v27  ;;  %v130_v30 = vadd.f32 %v129_v28, %v128_v26 }
 0x122   :  { %v131_v31 = vmul.f32 0.125, %v130_v30  ;;  %v132_v32 = vmul.f32 %v123_v29, %v123_v29 }
 0x124   :  { %v133_v33 = vsub.f32 %v131_v31, %v132_v32 }
 0x126   :  { %v134_v34 = vmax.f32 %v133_v33, 0.0 }
 0x128   :  { %v135_v35 = vadd.f32 1e-05, %v134_v34 }
 0x12a   :  { %568 = vrsqrt.f32 %v135_v35 }
 0x134   :  { %v569_v39 = vpop.eup %568 }
 0x135   :  { %v137_v40 = vmul.f32 %v569_v39, %v748_v38 }
 0x137   :  { %v138_v42 = vmul.f32 %v137_v40, %v123_v29  ;;  %v146_v43 = vrot.slane %v137_v40, %v145_v41 }
 0x139   :  { %v140_v44 = vrot.slane %v138_v42, 7  ;;  %v147_v47 = vmul.f32 %v146_v43, %v110_v13 }
 0x13b   :  { %v142_v46 = vsub.f32 %v748_v38, %v140_v44 }
 0x13d   :  { %v151_v48 = vrot.slane %v142_v46, %v150_v45 }
 0x13f   :  { %v152_v49 = vadd.f32 %v151_v48, %v147_v47 }
 0x141   :  { %v153_v50 = vmax.f32 %v152_v49, 0.0 }
 0x143   :  { %v154_v51 = vpack.c.bf16 %v153_v50, %v153_v50 }
 0x145   :  { %519 = vmatmul.mubr.bf16.vlgmr.msra.gmra.mrb[0].mxu1 %v154_v51 }
 0x218   :  { %v253_v60 = vpop.f32.mrb[0].mxu1 }
 0x219   :  { %v259_v61 = vrot.slane %v253_v60, 4  ;;  %v266_v62 = vmul.f32 %v253_v60, %v253_v60  ;;  %v520_v63 = vpop.f32.mrb[1].mxu1 }
 0x21a   :  { %v256_v1 = vpop.f32.mrb[2].mxu1  ;;  %v434_v63 = vsub.s32 5, %v746_v37 }
 0x21b   :  { %v260_v2 = vadd.f32 %v259_v61, %v253_v60  ;;  %v267_v3 = vrot.slane %v266_v62, 4  ;;  %v521_v4 = vpop.f32.mrb[3].mxu1 }
 0x21d   :  { %v261_v5 = vrot.slane %v260_v2, 2  ;;  %v268_v6 = vadd.f32 %v267_v3, %v266_v62 }
 0x21f   :  { %v262_v7 = vadd.f32 %v261_v5, %v260_v2  ;;  %v269_v8 = vrot.slane %v268_v6, 2 }
 0x221   :  { %v263_v9 = vrot.slane %v262_v7, 1  ;;  %v270_v10 = vadd.f32 %v269_v8, %v268_v6 }
 0x223   :  { %v264_v11 = vadd.f32 %v263_v9, %v262_v7  ;;  %v271_v12 = vrot.slane %v270_v10, 1 }
 0x225   :  { %v265_v13 = vmul.f32 0.125, %v264_v11  ;;  %v272_v0 = vadd.f32 %v271_v12, %v270_v10 }
 0x227   :  { %v273_v14 = vmul.f32 0.125, %v272_v0  ;;  %v274_v15 = vmul.f32 %v265_v13, %v265_v13 }
 0x229   :  { %v275_v16 = vsub.f32 %v273_v14, %v274_v15 }
 0x22b   :  { %v276_v17 = vmax.f32 %v275_v16, 0.0 }
 0x22d   :  { %v277_v18 = vadd.f32 1e-05, %v276_v17 }
 0x22f   :  { %570 = vrsqrt.f32 %v277_v18 }
 0x239   :  { %v571_v19 = vpop.eup %570 }
 0x23a   :  { %v279_v20 = vmul.f32 %v571_v19, %v748_v38 }
 0x23c   :  { %v280_v22 = vmul.f32 %v279_v20, %v265_v13  ;;  %v288_v24 = vrot.slane %v279_v20, %v287_v21 }
 0x23e   :  { %v282_v23 = vrot.slane %v280_v22, 7  ;;  %v289_v27 = vmul.f32 %v288_v24, %v253_v60 }
 0x240   :  { %v284_v26 = vsub.f32 %v748_v38, %v282_v23 }
 0x242   :  { %v293_v28 = vrot.slane %v284_v26, %v292_v25 }
 0x244   :  { %v294_v29 = vadd.f32 %v293_v28, %v289_v27 }
 0x246   :  { %v295_v30 = vmax.f32 %v294_v29, 0.0 }
 0x248   :  { %v296_v31 = vpack.c.bf16 %v295_v30, %v295_v30 }
 0x24a   :  { %539 = vmatmul.mubr.bf16.vlgmr.msra.gmra.mrb[4].mxu0 %v296_v31 }
 0x31d   :  { %v395_v32 = vpop.f32.mrb[4].mxu0 }
 0x31e   :  { %v401_v33 = vrot.slane %v395_v32, 4  ;;  %v408_v34 = vmul.f32 %v395_v32, %v395_v32  ;;  %v540_v35 = vpop.f32.mrb[5].mxu0 }
 0x31f   :  { %v398_v36 = vpop.f32.mrb[6].mxu0 }
 0x320   :  { %v402_v39 = vadd.f32 %v401_v33, %v395_v32  ;;  %v409_v40 = vrot.slane %v408_v34, 4  ;;  %v541_v41 = vpop.f32.mrb[7].mxu0 }
 0x322   :  { %v403_v42 = vrot.slane %v402_v39, 2  ;;  %v410_v43 = vadd.f32 %v409_v40, %v408_v34 }
 0x324   :  { %v404_v44 = vadd.f32 %v403_v42, %v402_v39  ;;  %v411_v45 = vrot.slane %v410_v43, 2 }
 0x326   :  { %v405_v46 = vrot.slane %v404_v44, 1  ;;  %v412_v47 = vadd.f32 %v411_v45, %v410_v43 }
 0x328   :  { %v406_v48 = vadd.f32 %v405_v46, %v404_v44  ;;  %v413_v49 = vrot.slane %v412_v47, 1 }
 0x32a   :  { %v407_v50 = vmul.f32 0.125, %v406_v48  ;;  %v414_v51 = vadd.f32 %v413_v49, %v412_v47 }
 0x32c   :  { %v415_v52 = vmul.f32 0.125, %v414_v51  ;;  %v416_v53 = vmul.f32 %v407_v50, %v407_v50 }
 0x32e   :  { %v417_v54 = vsub.f32 %v415_v52, %v416_v53 }
 0x330   :  { %v418_v55 = vmax.f32 %v417_v54, 0.0 }
 0x332   :  { %v419_v56 = vadd.f32 1e-05, %v418_v55 }
 0x334   :  { %572 = vrsqrt.f32 %v419_v56 }
 0x33e   :  { %v573_v57 = vpop.eup %572 }
 0x33f   :  { %v421_v58 = vmul.f32 %v573_v57, %v748_v38 }
 0x341   :  { %v422_v60 = vmul.f32 %v421_v58, %v407_v50  ;;  %v430_v62 = vrot.slane %v421_v58, %v429_v59 }
 0x343   :  { %v424_v61 = vrot.slane %v422_v60, 7  ;;  %v431_v2 = vmul.f32 %v430_v62, %v395_v32 }
 0x345   :  { %v426_v1 = vsub.f32 %v748_v38, %v424_v61 }
 0x347   :  { %v435_v3 = vrot.slane %v426_v1, %v434_v63 }
 0x349   :  { %v436_v4 = vadd.f32 %v435_v3, %v431_v2 }
 0x34b   :  { %437 = vst [vmem:[#allocation8] sm:$0xff] %v436_v4 }
 0x34c   :  { %651 = shalt.err (!%p648_p0)
}
 0x34d   :  { %s652_s25 = scalar_lea.hbm %s784_s3, 128 }
 0x34e   :  { %p653_p1 = scmp.ne.s32.totalorder %s784_s3, %s652_s25  ;;  %p656_p2 = scmp.lt.u32.totalorder %s652_s25, %s784_s3 }
 0x350   :  { %p658_p3 = pnand %p656_p2, %p653_p1 }
 0x352   :  { %661 = shalt.err (!%p658_p3)
}
 0x353   :  { %447 = dma.vmem_to_hbm [thread:$0]  %s445_s21, 128, %s784_s3, [#allocation4]  }
 0x354   :  { %666 = dma.done.wait [#allocation4], 128  }
 0x355   :  { %667 = vsyncadd [#allocation4], 4294967168 }
 0x356   :  { %451 = vsyncpa [#allocation3], 1 }
 0x357   :  { %452 = vsyncpa [#allocation6], 1 }
 0x358   :  { %453 = vsyncpa [#allocation4], 1 }

</bundles_post_ra>
